<compile_context>
chip_gen: v6e
topology: v6e:2x2x1
jax: 0.10.0
libtpu: 0.0.40
codegen_flags: <defaults>
</compile_context>

<pallas_src>
import functools

import jax
import jax.numpy as jnp
from jax import lax
from jax.experimental import pallas as pl
from jax.experimental.pallas import tpu as pltpu


def _make_attn_kernel(sk, tk, n_kv, needs_mask):
    """Builds the kernel with static shape knowledge baked in via closure."""
    single_kv_step = (n_kv == 1)

    def kernel(scale_ref, q_ref, k_ref, v_ref, o_ref, q_sc, m_sc, l_sc, acc_sc):
        # scale_ref: (1,) f32 SMEM
        # q_ref: (TQ, D) f32, k_ref/v_ref: (TK, D) f32, o_ref: (TQ, D) f32
        kv = pl.program_id(2)

        if single_kv_step:
            # Only one KV step per (batch, q-tile): no running state needed.
            q = (q_ref[...] * scale_ref[0]).astype(jnp.bfloat16)
        else:
            @pl.when(kv == 0)
            def _():
                # Hoist the scale-fold + bf16 cast of Q out of the KV loop.
                q_sc[...] = (q_ref[...] * scale_ref[0]).astype(jnp.bfloat16)
                m_sc[...] = jnp.full_like(m_sc, -jnp.inf)
                l_sc[...] = jnp.zeros_like(l_sc)
                acc_sc[...] = jnp.zeros_like(acc_sc)

            q = q_sc[...]

        # In-kernel bf16 cast of K (DMA'd as f32 straight from the user input).
        k = k_ref[...].astype(jnp.bfloat16)

        # Q @ K^T as a contraction over the last axis of both operands
        # (no materialized transpose of K).  bf16 MXU, f32 accumulation.
        s = lax.dot_general(
            q, k,
            dimension_numbers=(((1,), (1,)), ((), ())),
            preferred_element_type=jnp.float32,
        )                                                    # (TQ, TK) f32

        if needs_mask:
            # Mask padded key columns in the (possibly partial) last KV tile.
            col = lax.broadcasted_iota(jnp.int32, s.shape, 1) + kv * tk
            s = jnp.where(col < sk, s, -1e30)

        v = v_ref[...].astype(jnp.bfloat16)

        if single_kv_step:
            # Plain softmax: no rescale passes.
            m = jnp.max(s, axis=-1, keepdims=True)
            p = jnp.exp(s - m)
            l = jnp.sum(p, axis=-1, keepdims=True)
            acc = jnp.dot(p.astype(jnp.bfloat16), v,
                          preferred_element_type=jnp.float32)
            inv_l = pl.reciprocal(l, approx=True)
            o_ref[...] = (acc * inv_l).astype(o_ref.dtype)
        else:
            # Online softmax over the key axis (all elementwise math in f32).
            m_prev = m_sc[...]
            m_new = jnp.maximum(m_prev, jnp.max(s, axis=-1, keepdims=True))
            alpha = jnp.exp(m_prev - m_new)
            p = jnp.exp(s - m_new)
            l_sc[...] = alpha * l_sc[...] + jnp.sum(p, axis=-1, keepdims=True)
            acc_sc[...] = alpha * acc_sc[...] + jnp.dot(
                p.astype(jnp.bfloat16), v,
                preferred_element_type=jnp.float32)
            m_sc[...] = m_new

            # (dropout is identity in eval mode) -> finalize on last KV tile.
            @pl.when(kv == n_kv - 1)
            def _():
                inv_l = pl.reciprocal(l_sc[...], approx=True)
                o_ref[...] = (acc_sc[...] * inv_l).astype(o_ref.dtype)

    return kernel


@functools.partial(jax.jit, static_argnames=("tq", "tk"))
def attention(query, key, value, scale_factor, *, tq=128, tk=512):
    """query: (B, SQ, D), key/value: (B, SK, D), scale_factor: (1,) f32.

    Defaults: tq=128 (full-width MXU rows), tk=512 (multiple of 256 -> fills
    the 2x256^2 MXU on v6e/v7x; clamped to SK so small problems run as a
    single grid step).  For long SQ with tight HBM BW, raising tq halves the
    number of K/V re-streams at the cost of some VMEM/vreg pressure.
    """
    assert query.ndim == 3 and key.ndim == 3 and value.ndim == 3
    b, sq, d = query.shape
    bk, sk, dk = key.shape
    assert bk == b and dk == d and value.shape == key.shape

    out_dtype = query.dtype
    scale = scale_factor.astype(jnp.float32)

    tq = min(tq, sq)
    if sk <= tk:
        tk = sk                      # single KV step, no masking needed
        needs_mask = False
    else:
        assert tk % 128 == 0
        needs_mask = (sk % tk) != 0  # mask padded key columns of last tile

    n_q = pl.cdiv(sq, tq)
    n_kv = pl.cdiv(sk, tk)
    grid = (b, n_q, n_kv)

    kernel = _make_attn_kernel(sk, tk, n_kv, needs_mask)

    out = pl.pallas_call(
        kernel,
        out_shape=jax.ShapeDtypeStruct((b, sq, d), out_dtype),
        grid_spec=pltpu.PrefetchScalarGridSpec(
            num_scalar_prefetch=0,
            grid=grid,
            in_specs=[
                # learned scalar lives in SMEM
                pl.BlockSpec(memory_space=pltpu.MemorySpace.SMEM),
                # query tiled along SQ (constant across the KV axis); the
                # leading batch dim is squeezed out of the kernel ref.
                pl.BlockSpec((None, tq, d), lambda bi, i, j: (bi, i, 0)),
                # key / value streamed per KV grid step (f32, cast in-kernel)
                pl.BlockSpec((None, tk, d), lambda bi, i, j: (bi, j, 0)),
                pl.BlockSpec((None, tk, d), lambda bi, i, j: (bi, j, 0)),
            ],
            out_specs=pl.BlockSpec((None, tq, d), lambda bi, i, j: (bi, i, 0)),
            scratch_shapes=[
                pltpu.VMEM((tq, d), jnp.bfloat16),  # scaled Q (bf16), hoisted
                pltpu.VMEM((tq, 1), jnp.float32),   # running max m
                pltpu.VMEM((tq, 1), jnp.float32),   # running sum l
                pltpu.VMEM((tq, d), jnp.float32),   # accumulator
            ],
        ),
        compiler_params=pltpu.CompilerParams(
            dimension_semantics=("parallel", "parallel", "arbitrary")),
    )(scale, query, key, value)

    return out


if __name__ == "__main__":
    # Small shapes consistent with the module: B=1, SQ=128, SK=256, D=256.
    rng = jax.random.PRNGKey(0)
    kq, kk, kv = jax.random.split(rng, 3)
    query = jax.random.normal(kq, (1, 128, 256), dtype=jnp.float32)
    key = jax.random.normal(kk, (1, 256, 256), dtype=jnp.float32)
    value = jax.random.normal(kv, (1, 256, 256), dtype=jnp.float32)

    # Parameter init matches torch.ones(1).
    scale_factor = jnp.ones((1,), dtype=jnp.float32)

    out = attention(query, key, value, scale_factor)
    out = jax.block_until_ready(out)

    # Reference check using the same numeric recipe as the kernel
    # (scale folded into Q, bf16 matmul operands, f32 accumulation/softmax).
    qb = (query * scale_factor[0]).astype(jnp.bfloat16)
    kb = key.astype(jnp.bfloat16)
    vb = value.astype(jnp.bfloat16)
    s = jnp.einsum("bqd,bkd->bqk", qb, kb, preferred_element_type=jnp.float32)
    p = jax.nn.softmax(s, axis=-1)
    ref = jnp.einsum("bqk,bkd->bqd", p.astype(jnp.bfloat16), vb,
                     preferred_element_type=jnp.float32)

    assert out.shape == (1, 128, 256)
    assert jnp.allclose(out, ref, atol=2e-2, rtol=2e-2), (
        float(jnp.max(jnp.abs(out - ref))))

    print("KERNEL_OK")
</pallas_src>

<mosaic_0001>
module attributes {stable_mosaic.version = 11 : i64} {
  func.func @kernel(%arg0: i32, %arg1: i32, %arg2: i32, %arg3: memref<1xf32, #tpu.memory_space<smem>>, %arg4: memref<1x128x256xf32, #tpu.memory_space<vmem>>, %arg5: memref<1x256x256xf32, #tpu.memory_space<vmem>>, %arg6: memref<1x256x256xf32, #tpu.memory_space<vmem>>, %arg7: memref<1x128x256xf32, #tpu.memory_space<vmem>>, %arg8: memref<128x256xbf16, #tpu.memory_space<vmem>>, %arg9: memref<128x1xf32, #tpu.memory_space<vmem>>, %arg10: memref<128x1xf32, #tpu.memory_space<vmem>>, %arg11: memref<128x256xf32, #tpu.memory_space<vmem>>) attributes {dimension_semantics = [#tpu.dimension_semantics<parallel>, #tpu.dimension_semantics<parallel>, #tpu.dimension_semantics<arbitrary>], iteration_bounds = array<i64: 1, 1, 1>, scalar_prefetch = 0 : i64, scratch_operands = 4 : i64, tpu.core_type = #tpu.core_type<tc>, window_params = [{transform_indices = @transform_0, window_bounds = array<i64: 1>}, {transform_indices = @transform_1, window_bounds = array<i64: 1, 128, 256>}, {transform_indices = @transform_2, window_bounds = array<i64: 1, 256, 256>}, {transform_indices = @transform_3, window_bounds = array<i64: 1, 256, 256>}, {transform_indices = @transform_4, window_bounds = array<i64: 1, 128, 256>}]} {
    %c0 = arith.constant 0 : index
    %c0_0 = arith.constant 0 : index
    %c0_1 = arith.constant 0 : index
    %0 = vector.load %arg4[%c0, %c0_0, %c0_1] : memref<1x128x256xf32, #tpu.memory_space<vmem>>, vector<1x128x256xf32>
    %1 = vector.shape_cast %0 : vector<1x128x256xf32> to vector<128x256xf32>
    %c0_2 = arith.constant 0 : index
    %2 = memref.load %arg3[%c0_2] : memref<1xf32, #tpu.memory_space<smem>>
    %3 = vector.broadcast %2 : f32 to vector<128x256xf32>
    %4 = arith.mulf %1, %3 : vector<128x256xf32>
    %5 = arith.truncf %4 : vector<128x256xf32> to vector<128x256xbf16>
    %c0_3 = arith.constant 0 : index
    %c0_4 = arith.constant 0 : index
    %c0_5 = arith.constant 0 : index
    %6 = vector.load %arg5[%c0_3, %c0_4, %c0_5] : memref<1x256x256xf32, #tpu.memory_space<vmem>>, vector<1x256x256xf32>
    %7 = vector.shape_cast %6 : vector<1x256x256xf32> to vector<256x256xf32>
    %8 = arith.truncf %7 : vector<256x256xf32> to vector<256x256xbf16>
    %cst = arith.constant dense<0.000000e+00> : vector<128x256xf32>
    %9 = tpu.matmul %5, %8, %cst {dimension_numbers = #tpu.dot_dimension_numbers<[1], [1], [0], [0], [0, 0, 1, 0], [], []>} : vector<128x256xbf16>, vector<256x256xbf16>, vector<128x256xf32> -> vector<128x256xf32>
    %c0_6 = arith.constant 0 : index
    %c0_7 = arith.constant 0 : index
    %c0_8 = arith.constant 0 : index
    %10 = vector.load %arg6[%c0_6, %c0_7, %c0_8] : memref<1x256x256xf32, #tpu.memory_space<vmem>>, vector<1x256x256xf32>
    %11 = vector.shape_cast %10 : vector<1x256x256xf32> to vector<256x256xf32>
    %12 = arith.truncf %11 : vector<256x256xf32> to vector<256x256xbf16>
    %cst_9 = arith.constant dense<0xFF800000> : vector<128xf32>
    %13 = vector.multi_reduction <maximumf>, %9, %cst_9 [1] : vector<128x256xf32> to vector<128xf32>
    %14 = vector.shape_cast %13 : vector<128xf32> to vector<128x1xf32>
    %15 = vector.broadcast %14 : vector<128x1xf32> to vector<128x256xf32>
    %16 = arith.subf %9, %15 : vector<128x256xf32>
    %17 = math.exp %16 : vector<128x256xf32>
    %cst_10 = arith.constant dense<0.000000e+00> : vector<128xf32>
    %18 = vector.multi_reduction <add>, %17, %cst_10 [1] : vector<128x256xf32> to vector<128xf32>
    %19 = vector.shape_cast %18 : vector<128xf32> to vector<128x1xf32>
    %20 = arith.truncf %17 : vector<128x256xf32> to vector<128x256xbf16>
    %cst_11 = arith.constant dense<0.000000e+00> : vector<128x256xf32>
    %21 = tpu.matmul %20, %12, %cst_11 {dimension_numbers = #tpu.dot_dimension_numbers<[1], [0], [0], [1], [0, 0, 1, 1], [], []>} : vector<128x256xbf16>, vector<256x256xbf16>, vector<128x256xf32> -> vector<128x256xf32>
    %22 = tpu.reciprocal %19 {approx = true} : vector<128x1xf32> -> vector<128x1xf32>
    %23 = vector.broadcast %22 : vector<128x1xf32> to vector<128x256xf32>
    %24 = arith.mulf %21, %23 : vector<128x256xf32>
    %c0_12 = arith.constant 0 : index
    %c0_13 = arith.constant 0 : index
    %c0_14 = arith.constant 0 : index
    %25 = vector.load %arg7[%c0_12, %c0_13, %c0_14] : memref<1x128x256xf32, #tpu.memory_space<vmem>>, vector<1x128x256xf32>
    %26 = vector.shape_cast %25 : vector<1x128x256xf32> to vector<128x256xf32>
    %27 = vector.shape_cast %24 : vector<128x256xf32> to vector<1x128x256xf32>
    tpu.vector_store %arg7[%c0_12, %c0_13, %c0_14], %27 {strides = array<i32>} : memref<1x128x256xf32, #tpu.memory_space<vmem>>, vector<1x128x256xf32>,
    return
  }
  func.func @transform_0(%arg0: i32, %arg1: i32, %arg2: i32) -> i32 {
    %c0_i32 = arith.constant 0 : i32
    %c0_i32_0 = arith.constant 0 : i32
    return %c0_i32 : i32
  }
  func.func @transform_1(%arg0: i32, %arg1: i32, %arg2: i32) -> (i32, i32, i32) {
    %c0_i32 = arith.constant 0 : i32
    %c0_i32_0 = arith.constant 0 : i32
    return %arg0, %arg1, %c0_i32 : i32, i32, i32
  }
  func.func @transform_2(%arg0: i32, %arg1: i32, %arg2: i32) -> (i32, i32, i32) {
    %c0_i32 = arith.constant 0 : i32
    %c0_i32_0 = arith.constant 0 : i32
    return %arg0, %arg2, %c0_i32 : i32, i32, i32
  }
  func.func @transform_3(%arg0: i32, %arg1: i32, %arg2: i32) -> (i32, i32, i32) {
    %c0_i32 = arith.constant 0 : i32
    %c0_i32_0 = arith.constant 0 : i32
    return %arg0, %arg2, %c0_i32 : i32, i32, i32
  }
  func.func @transform_4(%arg0: i32, %arg1: i32, %arg2: i32) -> (i32, i32, i32) {
    %c0_i32 = arith.constant 0 : i32
    %c0_i32_0 = arith.constant 0 : i32
    return %arg0, %arg1, %c0_i32 : i32, i32, i32
  }
}

</mosaic_0001>

<bundles_post_ra>
// kernel: attention.1
= control target key start
LH: loop header
LB: loop body
LE: loop exit
PB: predicated region body
PF: predicated region fallthrough
CT: control target
= control target key end

     0   :  { %10 = vsyncpa [#allocation8], 0  ;;  %s1274_s0 = inlined_call_operand.<no memory space> [shape: f32[1], index: 0, kind: input, shape index: {}]   ;;  %s1275_s1 = inlined_call_operand.hbm [shape: f32[1,128,256], index: 1, kind: input, shape index: {}]   ;;  %s1276_s2 = inlined_call_operand.hbm [shape: f32[1,256,256], index: 2, kind: input, shape index: {}]   ;;  %s1277_s3 = inlined_call_operand.hbm [shape: f32[1,256,256], index: 3, kind: input, shape index: {}]   ;;  %s1278_s4 = inlined_call_operand.hbm [shape: f32[1,128,256], index: 4, kind: output, shape index: {}]  }
   0x1   :  { %11 = vsyncpa [#allocation11], 0 }
   0x2   :  { %12 = vsyncpa [#allocation9], 0  ;;  %s1054_s15 = smov [#allocation10]   ;;  %s1055_s17 = smov [#allocation7]  }
   0x3   :  { %s32_s16 = sshll.u32 %s1054_s15, 4  ;;  %s20_s18 = sshll.u32 %s1055_s17, 4  ;;  %s33_s16 = int_to_ptr.vmem [resolvable:$true] %s32_s16  ;;  %s21_s18 = int_to_ptr.vmem [resolvable:$true] %s20_s18 }
   0x4   :  { %s976_s19 = scalar_lea.vmem %s33_s16, 8192  ;;  %p981_p1 = scmp.lt.s32.totalorder %s33_s16, %s33_s16 }
   0x5   :  { %p977_p0 = scmp.ne.s32.totalorder %s33_s16, %s976_s19  ;;  %p982_p2 = scmp.lt.s32.totalorder %s976_s19, %s976_s19 }
   0x7   :  { %p983_p3 = por %p982_p2, %p981_p1 }
   0x9   :  { %p984_p4 = pnand %p983_p3, %p977_p0 }
   0xb   :  { %987 = shalt.err (!%p984_p4)
}
   0xc   :  { %s1056_s20 = smov 256   ;;  %s1057_s21 = smov 16  }
   0xd   :  { %38 = dma.hbm_to_vmem [thread:$0]  %s1276_s2, 8192, %s33_s16, [#allocation11], %s1056_s20, %s1056_s20, %s1057_s21  }
   0xe   :  { %s996_s24 = scalar_lea.vmem %s21_s18, 4096  ;;  %p1001_p6 = scmp.lt.s32.totalorder %s21_s18, %s21_s18 }
   0xf   :  { %p997_p5 = scmp.ne.s32.totalorder %s21_s18, %s996_s24  ;;  %p1002_p7 = scmp.lt.s32.totalorder %s996_s24, %s996_s24 }
  0x11   :  { %p1003_p8 = por %p1002_p7, %p1001_p6 }
  0x13   :  { %p1004_p9 = pnand %p1003_p8, %p997_p5 }
  0x15   :  { %1007 = shalt.err (!%p1004_p9)
}
  0x16   :  { %26 = dma.hbm_to_vmem [thread:$0]  %s1275_s1, 4096, %s21_s18, [#allocation8], %s1056_s20, %s1056_s20, %s1057_s21  }
  0x17   :  { %s1058_s27 = smov [#allocation12]  }
  0x18   :  { %s44_s28 = sshll.u32 %s1058_s27, 4  ;;  %s45_s28 = int_to_ptr.vmem [resolvable:$true] %s44_s28 }
  0x19   :  { %s1016_s29 = scalar_lea.vmem %s45_s28, 8192  ;;  %p1021_p11 = scmp.lt.s32.totalorder %s45_s28, %s45_s28 }
  0x1a   :  { %p1017_p10 = scmp.ne.s32.totalorder %s45_s28, %s1016_s29  ;;  %p1022_p12 = scmp.lt.s32.totalorder %s1016_s29, %s1016_s29 }
  0x1c   :  { %p1023_p13 = por %p1022_p12, %p1021_p11 }
  0x1e   :  { %p1024_p0 = pnand %p1023_p13, %p1017_p10 }
  0x20   :  { %1027 = shalt.err (!%p1024_p0)
}
  0x21   :  { %50 = dma.hbm_to_vmem [thread:$0]  %s1277_s3, 8192, %s45_s28, [#allocation11], %s1056_s20, %s1056_s20, %s1057_s21  }
  0x22   :  { %1048 = dma.done.wait [#allocation8], 4096  }
  0x23   :  { %1049 = vsyncadd [#allocation8], 4294963200 }
  0x24   :  { %1050 = dma.done.wait [#allocation11], 16384  }
  0x25   :  { %1051 = vsyncadd [#allocation11], 4294950912  ;;  %v171_v0 = vld [vmem:[#allocation10 + $0xe8] sm:$0xff]  ;;  %v173_v1 = vld [vmem:[#allocation10 + $0xf8] sm:$0xff]  ;;  %v1106_v21 = vstv %s1274_s0  ;;  %s1059_s0 = smov [#allocation13]  }
  0x26   :  { %v170_v2 = vld [vmem:[#allocation10 + $0xe0] sm:$0xff]  ;;  %v221_v3 = vpack.c.bf16 %v173_v1, %v171_v0  ;;  %v172_v4 = vld [vmem:[#allocation10 + $0xf0] sm:$0xff]  ;;  %v167_v5 = vld [vmem:[#allocation10 + $0xc8] sm:$0xff]  ;;  %s853_s5 = sshll.u32 %s1059_s0, 4  ;;  %s854_s5 = int_to_ptr.vmem [resolvable:$true] %s853_s5 }
  0x27   :  { %v169_v6 = vld [vmem:[#allocation10 + $0xd8] sm:$0xff]  ;;  %v220_v7 = vpack.c.bf16 %v172_v4, %v170_v2  ;;  %v166_v9 = vld [vmem:[#allocation10 + $0xc0] sm:$0xff]  ;;  %v168_v10 = vld [vmem:[#allocation10 + $0xd0] sm:$0xff]  ;;  %s1028_s6 = scalar_lea.vmem %s854_s5, 4096  ;;  %p1033_p2 = scmp.lt.s32.totalorder %s854_s5, %s854_s5 }
  0x28   :  { %v219_v8 = vpack.c.bf16 %v169_v6, %v167_v5  ;;  %238 = vmatprep.subr.bf16.mxu0 %v221_v3  ;;  %v163_v11 = vld [vmem:[#allocation10 + $0xa8] sm:$0xff]  ;;  %v165_v12 = vld [vmem:[#allocation10 + $0xb8] sm:$0xff]  ;;  %v218_v13 = vpack.c.bf16 %v168_v10, %v166_v9  ;;  %v162_v15 = vld [vmem:[#allocation10 + $0xa0] sm:$0xff]  ;;  %p1029_p1 = scmp.ne.s32.totalorder %s854_s5, %s1028_s6  ;;  %p1034_p3 = scmp.lt.s32.totalorder %s1028_s6, %s1028_s6 }
  0x29   :  { %239 = vmatpush1.bf16.xpose.msra.mxu0 %v220_v7  ;;  %v217_v14 = vpack.c.bf16 %v165_v12, %v163_v11  ;;  %v164_v16 = vld [vmem:[#allocation10 + $0xb0] sm:$0xff]  ;;  %v159_v17 = vld [vmem:[#allocation10 + $0x88] sm:$0xff]  ;;  %v161_v18 = vld [vmem:[#allocation10 + $0x98] sm:$0xff] }
  0x2a   :  { %240 = vmatprep.subr.bf16.mxu0 %v219_v8  ;;  %v216_v19 = vpack.c.bf16 %v164_v16, %v162_v15  ;;  %v215_v20 = vpack.c.bf16 %v161_v18, %v159_v17  ;;  %v158_v22 = vld [vmem:[#allocation10 + $0x80] sm:$0xff]  ;;  %v160_v23 = vld [vmem:[#allocation10 + $0x90] sm:$0xff]  ;;  %v61_v24 = vld [vmem:[#allocation7 + $0x8] sm:$0xff]  ;;  %p1035_p4 = por %p1034_p3, %p1033_p2 }
  0x2b   :  { %v63_v25 = vld [vmem:[#allocation7 + $0x18] sm:$0xff]  ;;  %v155_v26 = vld [vmem:[#allocation10 + $0x68] sm:$0xff]  ;;  %v95_v28 = vmul.f32 %v1106_v21, %v61_v24  ;;  %v214_v30 = vpack.c.bf16 %v160_v23, %v158_v22  ;;  %v154_v33 = vld [vmem:[#allocation10 + $0x60] sm:$0xff] }
  0x2c   :  { %v157_v27 = vld [vmem:[#allocation10 + $0x78] sm:$0xff]  ;;  %v97_v29 = vmul.f32 %v1106_v21, %v63_v25  ;;  %v156_v34 = vld [vmem:[#allocation10 + $0x70] sm:$0xff]  ;;  %v151_v35 = vld [vmem:[#allocation10 + $0x48] sm:$0xff]  ;;  %p1036_p5 = pnand %p1035_p4, %p1029_p1 }
  0x2d   :  { %v213_v32 = vpack.c.bf16 %v157_v27, %v155_v26  ;;  %v153_v36 = vld [vmem:[#allocation10 + $0x58] sm:$0xff]  ;;  %v212_v37 = vpack.c.bf16 %v156_v34, %v154_v33  ;;  %v150_v39 = vld [vmem:[#allocation10 + $0x40] sm:$0xff]  ;;  %v152_v40 = vld [vmem:[#allocation10 + $0x50] sm:$0xff] }
  0x2e   :  { %v127_v31 = vpack.c.bf16 %v97_v29, %v95_v28  ;;  %v211_v38 = vpack.c.bf16 %v153_v36, %v151_v35  ;;  %v147_v41 = vld [vmem:[#allocation10 + $0x28] sm:$0xff]  ;;  %v149_v42 = vld [vmem:[#allocation10 + $0x38] sm:$0xff]  ;;  %v210_v43 = vpack.c.bf16 %v152_v40, %v150_v39  ;;  %v146_v45 = vld [vmem:[#allocation10 + $0x20] sm:$0xff] }
  0x2f   :  { %v209_v44 = vpack.c.bf16 %v149_v42, %v147_v41  ;;  %v148_v46 = vld [vmem:[#allocation10 + $0x30] sm:$0xff]  ;;  %v143_v47 = vld [vmem:[#allocation10 + $0x8] sm:$0xff]  ;;  %v145_v48 = vld [vmem:[#allocation10 + $0x18] sm:$0xff] }
  0x30   :  { %270 = vmatprep.mubr.bf16.mxu0 %v127_v31  ;;  %v208_v49 = vpack.c.bf16 %v148_v46, %v146_v45  ;;  %v207_v50 = vpack.c.bf16 %v145_v48, %v143_v47  ;;  %v142_v51 = vld [vmem:[#allocation10] sm:$0xff]  ;;  %v144_v52 = vld [vmem:[#allocation10 + $0x10] sm:$0xff]  ;;  %v203_v53 = vld [vmem:[#allocation10 + $0x1e8] sm:$0xff] }
  0x31   :  { %241 = vmatpush1.bf16.xpose.msra.mxu0 %v218_v13  ;;  %v205_v54 = vld [vmem:[#allocation10 + $0x1f8] sm:$0xff]  ;;  %v206_v55 = vpack.c.bf16 %v144_v52, %v142_v51  ;;  %v202_v57 = vld [vmem:[#allocation10 + $0x1e0] sm:$0xff]  ;;  %v204_v58 = vld [vmem:[#allocation10 + $0x1f0] sm:$0xff] }
  0x32   :  { %242 = vmatprep.subr.bf16.mxu0 %v217_v14  ;;  %v237_v56 = vpack.c.bf16 %v205_v54, %v203_v53  ;;  %v199_v59 = vld [vmem:[#allocation10 + $0x1c8] sm:$0xff]  ;;  %v201_v60 = vld [vmem:[#allocation10 + $0x1d8] sm:$0xff]  ;;  %v236_v61 = vpack.c.bf16 %v204_v58, %v202_v57  ;;  %v198_v63 = vld [vmem:[#allocation10 + $0x1c0] sm:$0xff] }
  0x33   :  { %v235_v62 = vpack.c.bf16 %v201_v60, %v199_v59  ;;  %v200_v0 = vld [vmem:[#allocation10 + $0x1d0] sm:$0xff]  ;;  %v195_v1 = vld [vmem:[#allocation10 + $0x1a8] sm:$0xff]  ;;  %v197_v2 = vld [vmem:[#allocation10 + $0x1b8] sm:$0xff] }
  0x34   :  { %v234_v3 = vpack.c.bf16 %v200_v0, %v198_v63  ;;  %v233_v4 = vpack.c.bf16 %v197_v2, %v195_v1  ;;  %v194_v5 = vld [vmem:[#allocation10 + $0x1a0] sm:$0xff]  ;;  %v196_v6 = vld [vmem:[#allocation10 + $0x1b0] sm:$0xff]  ;;  %v191_v7 = vld [vmem:[#allocation10 + $0x188] sm:$0xff] }
  0x35   :  { %v193_v8 = vld [vmem:[#allocation10 + $0x198] sm:$0xff]  ;;  %v232_v9 = vpack.c.bf16 %v196_v6, %v194_v5  ;;  %v190_v11 = vld [vmem:[#allocation10 + $0x180] sm:$0xff]  ;;  %v192_v12 = vld [vmem:[#allocation10 + $0x190] sm:$0xff] }
  0x36   :  { %v231_v10 = vpack.c.bf16 %v193_v8, %v191_v7  ;;  %v187_v13 = vld [vmem:[#allocation10 + $0x168] sm:$0xff]  ;;  %v189_v14 = vld [vmem:[#allocation10 + $0x178] sm:$0xff]  ;;  %v230_v15 = vpack.c.bf16 %v192_v12, %v190_v11  ;;  %v186_v17 = vld [vmem:[#allocation10 + $0x160] sm:$0xff] }
  0x37   :  { %v229_v16 = vpack.c.bf16 %v189_v14, %v187_v13  ;;  %v188_v18 = vld [vmem:[#allocation10 + $0x170] sm:$0xff]  ;;  %v182_v24 = vld [vmem:[#allocation10 + $0x140] sm:$0xff]  ;;  %v179_v26 = vld [vmem:[#allocation10 + $0x128] sm:$0xff] }
  0x38   :  { %v228_v22 = vpack.c.bf16 %v188_v18, %v186_v17  ;;  %v184_v25 = vld [vmem:[#allocation10 + $0x150] sm:$0xff]  ;;  %v181_v27 = vld [vmem:[#allocation10 + $0x138] sm:$0xff]  ;;  %v174_v36 = vld [vmem:[#allocation10 + $0x100] sm:$0xff] }
  0x39   :  { %243 = vmatpush1.bf16.xpose.msra.mxu0 %v216_v19  ;;  %v183_v19 = vld [vmem:[#allocation10 + $0x148] sm:$0xff]  ;;  %v226_v28 = vpack.c.bf16 %v184_v25, %v182_v24  ;;  %v225_v29 = vpack.c.bf16 %v181_v27, %v179_v26  ;;  %v180_v31 = vld [vmem:[#allocation10 + $0x130] sm:$0xff]  ;;  %v177_v33 = vld [vmem:[#allocation10 + $0x118] sm:$0xff] }
  0x3a   :  { %244 = vmatprep.subr.bf16.mxu0 %v215_v20  ;;  %v185_v20 = vld [vmem:[#allocation10 + $0x158] sm:$0xff]  ;;  %v60_v39 = vld [vmem:[#allocation7] sm:$0xff]  ;;  %v62_v40 = vld [vmem:[#allocation7 + $0x10] sm:$0xff] }
  0x3b   :  { %v227_v23 = vpack.c.bf16 %v185_v20, %v183_v19  ;;  %v65_v41 = vld [vmem:[#allocation7 + $0x28] sm:$0xff]  ;;  %v67_v42 = vld [vmem:[#allocation7 + $0x38] sm:$0xff]  ;;  %v68_v59 = vld [vmem:[#allocation7 + $0x40] sm:$0xff] }
  0x3c   :  { %v99_v45 = vmul.f32 %v1106_v21, %v65_v41  ;;  %v101_v46 = vmul.f32 %v1106_v21, %v67_v42  ;;  %v69_v51 = vld [vmem:[#allocation7 + $0x48] sm:$0xff]  ;;  %v71_v52 = vld [vmem:[#allocation7 + $0x58] sm:$0xff]  ;;  %v70_v60 = vld [vmem:[#allocation7 + $0x50] sm:$0xff]  ;;  %v102_v63 = vmul.f32 %v1106_v21, %v68_v59 }
  0x3d   :  { %v104_v0 = vmul.f32 %v1106_v21, %v70_v60  ;;  %v72_v5 = vld [vmem:[#allocation7 + $0x60] sm:$0xff]  ;;  %v74_v6 = vld [vmem:[#allocation7 + $0x70] sm:$0xff]  ;;  %v77_v7 = vld [vmem:[#allocation7 + $0x88] sm:$0xff] }
  0x3e   :  { %v129_v48 = vpack.c.bf16 %v101_v46, %v99_v45  ;;  %v79_v8 = vld [vmem:[#allocation7 + $0x98] sm:$0xff]  ;;  %v111_v11 = vmul.f32 %v1106_v21, %v77_v7  ;;  %v81_v17 = vld [vmem:[#allocation7 + $0xa8] sm:$0xff]  ;;  %v80_v26 = vld [vmem:[#allocation7 + $0xa0] sm:$0xff] }
  0x3f   :  { %v113_v12 = vmul.f32 %v1106_v21, %v79_v8  ;;  %v83_v18 = vld [vmem:[#allocation7 + $0xb8] sm:$0xff]  ;;  %v82_v27 = vld [vmem:[#allocation7 + $0xb0] sm:$0xff]  ;;  %v88_v46 = vld [vmem:[#allocation7 + $0xe0] sm:$0xff] }
  0x40   :  { %v375_v60 = vld [vmem:[#allocation12 + $0xc0] sm:$0xff]  ;;  %v369_v8 = vld [vmem:[#allocation12 + $0x90] sm:$0xff] }
  0x41   :  { %245 = vmatpush1.bf16.xpose.msra.mxu0 %v214_v30  ;;  %v178_v30 = vld [vmem:[#allocation10 + $0x120] sm:$0xff]  ;;  %v135_v14 = vpack.c.bf16 %v113_v12, %v111_v11 }
  0x42   :  { %246 = vmatprep.subr.bf16.mxu0 %v213_v32  ;;  %v175_v32 = vld [vmem:[#allocation10 + $0x108] sm:$0xff]  ;;  %v224_v34 = vpack.c.bf16 %v180_v31, %v178_v30  ;;  %v114_v30 = vmul.f32 %v1106_v21, %v80_v26  ;;  %v116_v31 = vmul.f32 %v1106_v21, %v82_v27  ;;  %v367_v7 = vld [vmem:[#allocation12 + $0x80] sm:$0xff]  ;;  %v357_v27 = vld [vmem:[#allocation12 + $0x30] sm:$0xff] }
  0x43   :  { %v223_v35 = vpack.c.bf16 %v177_v33, %v175_v32  ;;  %v423_v11 = vpack.c.bf16 %v369_v8, %v367_v7  ;;  %v355_v26 = vld [vmem:[#allocation12 + $0x20] sm:$0xff]  ;;  %v401_v7 = vld [vmem:[#allocation12 + $0x190] sm:$0xff] }
  0x49   :  { %247 = vmatpush1.bf16.xpose.msra.mxu0 %v212_v37  ;;  %v176_v37 = vld [vmem:[#allocation10 + $0x110] sm:$0xff] }
  0x4a   :  { %248 = vmatprep.subr.bf16.mxu0 %v211_v38  ;;  %v222_v38 = vpack.c.bf16 %v176_v37, %v174_v36  ;;  %v84_v36 = vld [vmem:[#allocation7 + $0xc0] sm:$0xff]  ;;  %v86_v37 = vld [vmem:[#allocation7 + $0xd0] sm:$0xff] }
  0x4b   :  { %v120_v41 = vmul.f32 %v1106_v21, %v86_v37 }
  0x51   :  { %249 = vmatpush1.bf16.xpose.msra.mxu0 %v210_v43  ;;  %v94_v43 = vmul.f32 %v1106_v21, %v60_v39  ;;  %v91_v39 = vld [vmem:[#allocation7 + $0xf8] sm:$0xff] }
  0x52   :  { %250 = vmatprep.subr.bf16.mxu0 %v209_v44  ;;  %v96_v44 = vmul.f32 %v1106_v21, %v62_v40  ;;  %v118_v40 = vmul.f32 %v1106_v21, %v84_v36 }
  0x54   :  { %v126_v47 = vpack.c.bf16 %v96_v44, %v94_v43  ;;  %v125_v43 = vmul.f32 %v1106_v21, %v91_v39  ;;  %v138_v44 = vpack.c.bf16 %v120_v41, %v118_v40  ;;  %v413_v39 = vld [vmem:[#allocation12 + $0x1f0] sm:$0xff]  ;;  %v408_v40 = vld [vmem:[#allocation12 + $0x1c8] sm:$0xff]  ;;  %v410_v41 = vld [vmem:[#allocation12 + $0x1d8] sm:$0xff] }
  0x59   :  { %251 = vmatpush1.bf16.xpose.msra.mxu0 %v208_v49  ;;  %v64_v49 = vld [vmem:[#allocation7 + $0x20] sm:$0xff] }
  0x5a   :  { %252 = vmatprep.subr.bf16.mxu0 %v207_v50  ;;  %v66_v50 = vld [vmem:[#allocation7 + $0x30] sm:$0xff]  ;;  %v98_v53 = vmul.f32 %v1106_v21, %v64_v49 }
  0x5b   :  { %v100_v54 = vmul.f32 %v1106_v21, %v66_v50 }
  0x5d   :  { %v128_v57 = vpack.c.bf16 %v100_v54, %v98_v53  ;;  %v379_v53 = vld [vmem:[#allocation12 + $0xe0] sm:$0xff] }
  0x61   :  { %253 = vmatpush1.bf16.xpose.msra.mxu0 %v206_v55  ;;  %v103_v55 = vmul.f32 %v1106_v21, %v69_v51  ;;  %v380_v51 = vld [vmem:[#allocation12 + $0xe8] sm:$0xff] }
  0x62   :  { %254 = vmatprep.subr.bf16.mxu0 %v237_v56  ;;  %v105_v56 = vmul.f32 %v1106_v21, %v71_v52  ;;  %v382_v52 = vld [vmem:[#allocation12 + $0xf8] sm:$0xff] }
  0x63   :  { %v430_v54 = vpack.c.bf16 %v382_v52, %v380_v51 }
  0x64   :  { %v131_v58 = vpack.c.bf16 %v105_v56, %v103_v55  ;;  %v381_v55 = vld [vmem:[#allocation12 + $0xf0] sm:$0xff]  ;;  %v376_v56 = vld [vmem:[#allocation12 + $0xc8] sm:$0xff] }
  0x65   :  { %655 = vmatprep.subr.bf16.mxu1 %v430_v54 }
  0x69   :  { %255 = vmatpush2.bf16.xpose.msra.mxu0 %v236_v61  ;;  %v73_v61 = vld [vmem:[#allocation7 + $0x68] sm:$0xff] }
  0x6a   :  { %256 = vmatprep.subr.bf16.mxu0 %v235_v62  ;;  %v75_v62 = vld [vmem:[#allocation7 + $0x78] sm:$0xff]  ;;  %v107_v1 = vmul.f32 %v1106_v21, %v73_v61  ;;  %v377_v61 = vld [vmem:[#allocation12 + $0xd0] sm:$0xff] }
  0x6b   :  { %v109_v2 = vmul.f32 %v1106_v21, %v75_v62  ;;  %v372_v62 = vld [vmem:[#allocation12 + $0xa8] sm:$0xff] }
  0x71   :  { %257 = vmatpush2.bf16.xpose.msra.mxu0 %v234_v3  ;;  %v130_v3 = vpack.c.bf16 %v104_v0, %v102_v63  ;;  %v374_v63 = vld [vmem:[#allocation12 + $0xb8] sm:$0xff]  ;;  %v427_v0 = vpack.c.bf16 %v377_v61, %v375_v60 }
  0x72   :  { %258 = vmatprep.subr.bf16.mxu0 %v233_v4  ;;  %v133_v4 = vpack.c.bf16 %v109_v2, %v107_v1  ;;  %v371_v1 = vld [vmem:[#allocation12 + $0xa0] sm:$0xff]  ;;  %v373_v2 = vld [vmem:[#allocation12 + $0xb0] sm:$0xff] }
  0x79   :  { %259 = vmatpush2.bf16.xpose.msra.mxu0 %v232_v9  ;;  %v106_v9 = vmul.f32 %v1106_v21, %v72_v5  ;;  %v425_v5 = vpack.c.bf16 %v373_v2, %v371_v1  ;;  %v400_v2 = vld [vmem:[#allocation12 + $0x188] sm:$0xff] }
  0x7a   :  { %260 = vmatprep.subr.bf16.mxu0 %v231_v10  ;;  %v108_v10 = vmul.f32 %v1106_v21, %v74_v6 }
  0x7c   :  { %v132_v13 = vpack.c.bf16 %v108_v10, %v106_v9  ;;  %v364_v9 = vld [vmem:[#allocation12 + $0x68] sm:$0xff]  ;;  %v366_v10 = vld [vmem:[#allocation12 + $0x78] sm:$0xff] }
  0x7d   :  { %v422_v12 = vpack.c.bf16 %v366_v10, %v364_v9 }
  0x81   :  { %261 = vmatpush2.bf16.xpose.msra.mxu0 %v230_v15  ;;  %v76_v15 = vld [vmem:[#allocation7 + $0x80] sm:$0xff] }
  0x82   :  { %262 = vmatprep.subr.bf16.mxu0 %v229_v16  ;;  %v78_v16 = vld [vmem:[#allocation7 + $0x90] sm:$0xff]  ;;  %v110_v19 = vmul.f32 %v1106_v21, %v76_v15  ;;  %v360_v15 = vld [vmem:[#allocation12 + $0x48] sm:$0xff] }
  0x83   :  { %v112_v20 = vmul.f32 %v1106_v21, %v78_v16  ;;  %v362_v16 = vld [vmem:[#allocation12 + $0x58] sm:$0xff] }
  0x85   :  { %v134_v24 = vpack.c.bf16 %v112_v20, %v110_v19  ;;  %v359_v19 = vld [vmem:[#allocation12 + $0x40] sm:$0xff]  ;;  %v361_v20 = vld [vmem:[#allocation12 + $0x50] sm:$0xff] }
  0x89   :  { %263 = vmatpush2.bf16.xpose.msra.mxu0 %v228_v22  ;;  %v115_v22 = vmul.f32 %v1106_v21, %v81_v17 }
  0x8a   :  { %264 = vmatprep.subr.bf16.mxu0 %v227_v23  ;;  %v117_v23 = vmul.f32 %v1106_v21, %v83_v18  ;;  %v420_v18 = vpack.c.bf16 %v362_v16, %v360_v15  ;;  %v395_v15 = vld [vmem:[#allocation12 + $0x160] sm:$0xff]  ;;  %v397_v16 = vld [vmem:[#allocation12 + $0x170] sm:$0xff] }
  0x8c   :  { %v137_v25 = vpack.c.bf16 %v117_v23, %v115_v22  ;;  %v356_v22 = vld [vmem:[#allocation12 + $0x28] sm:$0xff]  ;;  %v358_v23 = vld [vmem:[#allocation12 + $0x38] sm:$0xff] }
  0x91   :  { %265 = vmatpush2.bf16.xpose.msra.mxu0 %v226_v28  ;;  %v85_v28 = vld [vmem:[#allocation7 + $0xc8] sm:$0xff] }
  0x92   :  { %266 = vmatprep.subr.bf16.mxu0 %v225_v29  ;;  %v87_v29 = vld [vmem:[#allocation7 + $0xd8] sm:$0xff]  ;;  %v119_v32 = vmul.f32 %v1106_v21, %v85_v28  ;;  %v352_v28 = vld [vmem:[#allocation12 + $0x8] sm:$0xff] }
  0x93   :  { %v121_v33 = vmul.f32 %v1106_v21, %v87_v29  ;;  %v354_v29 = vld [vmem:[#allocation12 + $0x18] sm:$0xff] }
  0x99   :  { %267 = vmatpush2.bf16.xpose.msra.mxu0 %v224_v34  ;;  %v136_v34 = vpack.c.bf16 %v116_v31, %v114_v30  ;;  %v417_v30 = vpack.c.bf16 %v357_v27, %v355_v26  ;;  %v416_v31 = vpack.c.bf16 %v354_v29, %v352_v28  ;;  %v393_v26 = vld [vmem:[#allocation12 + $0x150] sm:$0xff] }
  0x9a   :  { %268 = vmatprep.subr.bf16.mxu0 %v223_v35  ;;  %v139_v35 = vpack.c.bf16 %v121_v33, %v119_v32  ;;  %v351_v32 = vld [vmem:[#allocation12] sm:$0xff]  ;;  %v353_v33 = vld [vmem:[#allocation12 + $0x10] sm:$0xff] }
  0x9b   :  { %v415_v36 = vpack.c.bf16 %v353_v33, %v351_v32 }
  0xa1   :  { %269 = vmatpush2.bf16.xpose.msra.mxu0 %v222_v38  ;;  %v89_v38 = vld [vmem:[#allocation7 + $0xe8] sm:$0xff] }
  0xa2   :  { %v123_v42 = vmul.f32 %v1106_v21, %v89_v38  ;;  %v411_v38 = vld [vmem:[#allocation12 + $0x1e0] sm:$0xff] }
  0xa4   :  { %v141_v45 = vpack.c.bf16 %v125_v43, %v123_v42  ;;  %v445_v42 = vpack.c.bf16 %v413_v39, %v411_v38  ;;  %v444_v43 = vpack.c.bf16 %v410_v41, %v408_v40  ;;  %v384_v39 = vld [vmem:[#allocation12 + $0x108] sm:$0xff]  ;;  %v386_v40 = vld [vmem:[#allocation12 + $0x118] sm:$0xff] }
  0xa8   :  { %271 = vmatmul.mubr.bf16.vlgmr.msra.gmra.mxu0 %v126_v47  ;;  %v90_v47 = vld [vmem:[#allocation7 + $0xf0] sm:$0xff] }
  0xa9   :  { %280 = vmatprep.mubr.bf16.mxu0 %v129_v48  ;;  %v122_v48 = vmul.f32 %v1106_v21, %v88_v46  ;;  %v124_v49 = vmul.f32 %v1106_v21, %v90_v47  ;;  %v426_v21 = vpack.c.bf16 %v374_v63, %v372_v62  ;;  %v403_v62 = vld [vmem:[#allocation12 + $0x1a0] sm:$0xff]  ;;  %v405_v63 = vld [vmem:[#allocation12 + $0x1b0] sm:$0xff] }
  0xab   :  { %v140_v50 = vpack.c.bf16 %v124_v49, %v122_v48 }
  0xb0   :  { %281 = vmatmul.mubr.bf16.gmra.mxu0 %v128_v57  ;;  %v378_v57 = vld [vmem:[#allocation12 + $0xd8] sm:$0xff] }
  0xb1   :  { %290 = vmatprep.mubr.bf16.mxu0 %v131_v58  ;;  %v429_v58 = vpack.c.bf16 %v381_v55, %v379_v53  ;;  %v428_v59 = vpack.c.bf16 %v378_v57, %v376_v56 }
  0xb3   :  { %656 = vmatpush1.bf16.msra.mxu1 %v429_v58  ;;  %v404_v58 = vld [vmem:[#allocation12 + $0x1a8] sm:$0xff] }
  0xb4   :  { %657 = vmatprep.subr.bf16.mxu1 %v428_v59  ;;  %v406_v59 = vld [vmem:[#allocation12 + $0x1b8] sm:$0xff] }
  0xb5   :  { %v442_v61 = vpack.c.bf16 %v406_v59, %v404_v58 }
  0xb7   :  { %658 = vmatpush1.bf16.msra.mxu1 %v427_v0 }
  0xb8   :  { %291 = vmatmul.mubr.bf16.gmra.mxu0 %v130_v3  ;;  %v368_v3 = vld [vmem:[#allocation12 + $0x88] sm:$0xff]  ;;  %659 = vmatprep.subr.bf16.mxu1 %v426_v21  ;;  %v441_v21 = vpack.c.bf16 %v405_v63, %v403_v62 }
  0xb9   :  { %300 = vmatprep.mubr.bf16.mxu0 %v133_v4  ;;  %v370_v4 = vld [vmem:[#allocation12 + $0x98] sm:$0xff] }
  0xba   :  { %v424_v6 = vpack.c.bf16 %v370_v4, %v368_v3  ;;  %v402_v3 = vld [vmem:[#allocation12 + $0x198] sm:$0xff] }
  0xbb   :  { %660 = vmatpush1.bf16.msra.mxu1 %v425_v5  ;;  %v440_v5 = vpack.c.bf16 %v402_v3, %v400_v2 }
  0xbc   :  { %661 = vmatprep.subr.bf16.mxu1 %v424_v6  ;;  %v399_v6 = vld [vmem:[#allocation12 + $0x180] sm:$0xff] }
  0xbd   :  { %v439_v9 = vpack.c.bf16 %v401_v7, %v399_v6 }
  0xbf   :  { %662 = vmatpush1.bf16.msra.mxu1 %v423_v11  ;;  %v396_v11 = vld [vmem:[#allocation12 + $0x168] sm:$0xff] }
  0xc0   :  { %301 = vmatmul.mubr.bf16.gmra.mxu0 %v132_v13  ;;  %v363_v13 = vld [vmem:[#allocation12 + $0x60] sm:$0xff]  ;;  %663 = vmatprep.subr.bf16.mxu1 %v422_v12  ;;  %v398_v12 = vld [vmem:[#allocation12 + $0x178] sm:$0xff] }
  0xc1   :  { %310 = vmatprep.mubr.bf16.mxu0 %v135_v14  ;;  %v365_v14 = vld [vmem:[#allocation12 + $0x70] sm:$0xff] }
  0xc2   :  { %v421_v17 = vpack.c.bf16 %v365_v14, %v363_v13  ;;  %v438_v14 = vpack.c.bf16 %v398_v12, %v396_v11 }
  0xc4   :  { %664 = vmatpush1.bf16.msra.mxu1 %v421_v17 }
  0xc5   :  { %665 = vmatprep.subr.bf16.mxu1 %v420_v18  ;;  %v437_v18 = vpack.c.bf16 %v397_v16, %v395_v15 }
  0xc8   :  { %311 = vmatmul.mubr.bf16.gmra.mxu0 %v134_v24  ;;  %v419_v24 = vpack.c.bf16 %v361_v20, %v359_v19  ;;  %v392_v20 = vld [vmem:[#allocation12 + $0x148] sm:$0xff] }
  0xc9   :  { %320 = vmatprep.mubr.bf16.mxu0 %v137_v25  ;;  %v418_v25 = vpack.c.bf16 %v358_v23, %v356_v22  ;;  %v394_v22 = vld [vmem:[#allocation12 + $0x158] sm:$0xff] }
  0xca   :  { %666 = vmatpush1.bf16.msra.mxu1 %v419_v24  ;;  %v436_v24 = vpack.c.bf16 %v394_v22, %v392_v20 }
  0xcb   :  { %667 = vmatprep.subr.bf16.mxu1 %v418_v25  ;;  %v391_v25 = vld [vmem:[#allocation12 + $0x140] sm:$0xff] }
  0xcc   :  { %v435_v28 = vpack.c.bf16 %v393_v26, %v391_v25 }
  0xce   :  { %668 = vmatpush1.bf16.msra.mxu1 %v417_v30  ;;  %v388_v30 = vld [vmem:[#allocation12 + $0x128] sm:$0xff] }
  0xcf   :  { %669 = vmatprep.subr.bf16.mxu1 %v416_v31  ;;  %v390_v31 = vld [vmem:[#allocation12 + $0x138] sm:$0xff] }
  0xd0   :  { %321 = vmatmul.mubr.bf16.gmra.mxu0 %v136_v34  ;;  %v412_v34 = vld [vmem:[#allocation12 + $0x1e8] sm:$0xff]  ;;  %v434_v33 = vpack.c.bf16 %v390_v31, %v388_v30 }
  0xd1   :  { %330 = vmatprep.mubr.bf16.mxu0 %v139_v35  ;;  %v414_v35 = vld [vmem:[#allocation12 + $0x1f8] sm:$0xff] }
  0xd2   :  { %v446_v37 = vpack.c.bf16 %v414_v35, %v412_v34  ;;  %670 = vmatpush1.bf16.msra.mxu1 %v415_v36  ;;  %v387_v34 = vld [vmem:[#allocation12 + $0x120] sm:$0xff]  ;;  %v389_v35 = vld [vmem:[#allocation12 + $0x130] sm:$0xff] }
  0xd4   :  { %671 = vmatprep.subr.bf16.mxu1 %v446_v37  ;;  %v433_v37 = vpack.c.bf16 %v389_v35, %v387_v34 }
  0xd6   :  { %672 = vmatpush2.bf16.msra.mxu1 %v445_v42  ;;  %v432_v42 = vpack.c.bf16 %v386_v40, %v384_v39 }
  0xd7   :  { %673 = vmatprep.subr.bf16.mxu1 %v444_v43  ;;  %v383_v43 = vld [vmem:[#allocation12 + $0x100] sm:$0xff] }
  0xd8   :  { %331 = vmatmul.mubr.bf16.gmra.mxu0 %v138_v44  ;;  %v407_v44 = vld [vmem:[#allocation12 + $0x1c0] sm:$0xff] }
  0xd9   :  { %340 = vmatprep.mubr.bf16.mxu0 %v141_v45  ;;  %v409_v45 = vld [vmem:[#allocation12 + $0x1d0] sm:$0xff] }
  0xda   :  { %v443_v46 = vpack.c.bf16 %v409_v45, %v407_v44  ;;  %v385_v44 = vld [vmem:[#allocation12 + $0x110] sm:$0xff] }
  0xdc   :  { %674 = vmatpush2.bf16.msra.mxu1 %v443_v46  ;;  %v431_v46 = vpack.c.bf16 %v385_v44, %v383_v43 }
  0xdd   :  { %675 = vmatprep.subr.bf16.mxu1 %v442_v61 }
  0xe0   :  { %341 = vmatmul.mubr.bf16.gmra.mxu0 %v140_v50  ;;  %676 = vmatpush2.bf16.msra.mxu1 %v441_v21 }
  0xe1   :  { %677 = vmatprep.subr.bf16.mxu1 %v440_v5 }
  0xe4   :  { %678 = vmatpush2.bf16.msra.mxu1 %v439_v9 }
  0xe5   :  { %679 = vmatprep.subr.bf16.mxu1 %v438_v14 }
  0xe8   :  { %680 = vmatpush2.bf16.msra.mxu1 %v437_v18 }
  0xe9   :  { %681 = vmatprep.subr.bf16.mxu1 %v436_v24 }
  0xec   :  { %682 = vmatpush2.bf16.msra.mxu1 %v435_v28 }
  0xed   :  { %683 = vmatprep.subr.bf16.mxu1 %v434_v33 }
  0xf0   :  { %684 = vmatpush2.bf16.msra.mxu1 %v433_v37 }
  0xf1   :  { %685 = vmatprep.subr.bf16.mxu1 %v432_v42 }
  0xf4   :  { %686 = vmatpush2.bf16.msra.mxu1 %v431_v46 }
 0x168   :  { %v1140_v47 = vpop.f32.mrf.mxu0 }
 0x16a   :  { %v1142_v48 = vpop.f32.mrf.mxu0 }
 0x16b   :  { %v447_v49 = vmax.f32 %v1140_v47, %v1142_v48 }
 0x16c   :  { %v1146_v50 = vpop.f32.mrf.mxu0 }
 0x16d   :  { %448 = vmax.xlane.f32.xlu0 %v447_v49 }
 0x16e   :  { %v1148_v51 = vpop.f32.mrf.mxu0 }
 0x16f   :  { %v450_v52 = vmax.f32 %v1146_v50, %v1148_v51 }
 0x170   :  { %v1152_v53 = vpop.f32.mrf.mxu0 }
 0x171   :  { %451 = vmax.xlane.f32.xlu0 %v450_v52 }
 0x172   :  { %v1154_v54 = vpop.f32.mrf.mxu0 }
 0x173   :  { %v453_v55 = vmax.f32 %v1152_v53, %v1154_v54 }
 0x174   :  { %v1158_v56 = vpop.f32.mrf.mxu0 }
 0x175   :  { %454 = vmax.xlane.f32.xlu1 %v453_v55 }
 0x176   :  { %v1160_v57 = vpop.f32.mrf.mxu0 }
 0x177   :  { %v456_v60 = vmax.f32 %v1158_v56, %v1160_v57 }
 0x178   :  { %v1164_v0 = vpop.f32.mrf.mxu0 }
 0x179   :  { %457 = vmax.xlane.f32.xlu1 %v456_v60 }
 0x17a   :  { %v1166_v1 = vpop.f32.mrf.mxu0 }
 0x17b   :  { %v459_v4 = vmax.f32 %v1164_v0, %v1166_v1 }
 0x17c   :  { %v1170_v8 = vpop.f32.mrf.mxu0 }
 0x17d   :  { %460 = vmax.xlane.f32.xlu0 %v459_v4 }
 0x17e   :  { %v1172_v10 = vpop.f32.mrf.mxu0 }
 0x17f   :  { %v462_v13 = vmax.f32 %v1170_v8, %v1172_v10 }
 0x180   :  { %v1176_v17 = vpop.f32.mrf.mxu0 }
 0x181   :  { %463 = vmax.xlane.f32.xlu1 %v462_v13 }
 0x182   :  { %v1178_v19 = vpop.f32.mrf.mxu0 }
 0x183   :  { %v465_v23 = vmax.f32 %v1176_v17, %v1178_v19 }
 0x184   :  { %v1182_v27 = vpop.f32.mrf.mxu0 }
 0x185   :  { %466 = vmax.xlane.f32.xlu0 %v465_v23 }
 0x186   :  { %v1184_v29 = vpop.f32.mrf.mxu0 }
 0x187   :  { %v468_v32 = vmax.f32 %v1182_v27, %v1184_v29 }
 0x188   :  { %v1188_v36 = vpop.f32.mrf.mxu0 }
 0x189   :  { %469 = vmax.xlane.f32.xlu1 %v468_v32 }
 0x18a   :  { %v1190_v38 = vpop.f32.mrf.mxu0 }
 0x18b   :  { %v471_v41 = vmax.f32 %v1188_v36, %v1190_v38 }
 0x18c   :  { %v1194_v45 = vpop.f32.mrf.mxu0 }
 0x18d   :  { %472 = vmax.xlane.f32.xlu0 %v471_v41 }
 0x18e   :  { %v1196_v49 = vpop.f32.mrf.mxu0 }
 0x18f   :  { %v474_v52 = vmax.f32 %v1194_v45, %v1196_v49 }
 0x190   :  { %v1200_v55 = vpop.f32.mrf.mxu0 }
 0x191   :  { %475 = vmax.xlane.f32.xlu1 %v474_v52 }
 0x192   :  { %v1202_v58 = vpop.f32.mrf.mxu0 }
 0x193   :  { %v477_v59 = vmax.f32 %v1200_v55, %v1202_v58 }
 0x194   :  { %v1206_v60 = vpop.f32.mrf.mxu0 }
 0x195   :  { %478 = vmax.xlane.f32.xlu0 %v477_v59 }
 0x196   :  { %v1208_v61 = vpop.f32.mrf.mxu0 }
 0x197   :  { %v480_v62 = vmax.f32 %v1206_v60, %v1208_v61 }
 0x198   :  { %v1212_v63 = vpop.f32.mrf.mxu0 }
 0x199   :  { %481 = vmax.xlane.f32.xlu1 %v480_v62 }
 0x19a   :  { %v1214_v21 = vpop.f32.mrf.mxu0 }
 0x19b   :  { %v483_v2 = vmax.f32 %v1212_v63, %v1214_v21 }
 0x19c   :  { %v1218_v3 = vpop.f32.mrf.mxu0 }
 0x19d   :  { %484 = vmax.xlane.f32.xlu0 %v483_v2 }
 0x19e   :  { %v1220_v4 = vpop.f32.mrf.mxu0 }
 0x19f   :  { %v486_v5 = vmax.f32 %v1218_v3, %v1220_v4 }
 0x1a0   :  { %v1224_v6 = vpop.f32.mrf.mxu0 }
 0x1a1   :  { %487 = vmax.xlane.f32.xlu1 %v486_v5 }
 0x1a2   :  { %v1226_v7 = vpop.f32.mrf.mxu0 }
 0x1a3   :  { %v489_v9 = vmax.f32 %v1224_v6, %v1226_v7 }
 0x1a4   :  { %v1230_v11 = vpop.f32.mrf.mxu0 }
 0x1a5   :  { %490 = vmax.xlane.f32.xlu0 %v489_v9 }
 0x1a6   :  { %v1232_v12 = vpop.f32.mrf.mxu0 }
 0x1a7   :  { %v492_v13 = vmax.f32 %v1230_v11, %v1232_v12 }
 0x1a9   :  { %493 = vmax.xlane.f32.xlu1 %v492_v13 }
 0x1f6   :  { %v449_v14 = vpop.xlane.xlu0 %448 }
 0x1f7   :  { %v495_v15 = vsub.f32 %v1140_v47, %v449_v14  ;;  %v496_v16 = vsub.f32 %v1142_v48, %v449_v14 }
 0x1f9   :  { %v527_v18 = vmul.f32 1.442695, %v495_v15  ;;  %v529_v20 = vmul.f32 1.442695, %v496_v16 }
 0x1fa   :  { %v452_v22 = vpop.xlane.xlu0 %451 }
 0x1fb   :  { %872 = vpow2.f32 %v527_v18  ;;  %v497_v23 = vsub.f32 %v1146_v50, %v452_v22  ;;  %v498_v24 = vsub.f32 %v1148_v51, %v452_v22 }
 0x1fc   :  { %874 = vpow2.f32 %v529_v20 }
 0x1fd   :  { %v531_v25 = vmul.f32 1.442695, %v497_v23  ;;  %v533_v26 = vmul.f32 1.442695, %v498_v24 }
 0x1fe   :  { %v455_v28 = vpop.xlane.xlu1 %454 }
 0x1ff   :  { %876 = vpow2.f32 %v531_v25  ;;  %v499_v30 = vsub.f32 %v1152_v53, %v455_v28  ;;  %v500_v31 = vsub.f32 %v1154_v54, %v455_v28 }
 0x200   :  { %878 = vpow2.f32 %v533_v26 }
 0x201   :  { %v535_v47 = vmul.f32 1.442695, %v499_v30  ;;  %v537_v48 = vmul.f32 1.442695, %v500_v31 }
 0x202   :  { %v458_v32 = vpop.xlane.xlu1 %457 }
 0x203   :  { %880 = vpow2.f32 %v535_v47  ;;  %v501_v33 = vsub.f32 %v1158_v56, %v458_v32  ;;  %v502_v50 = vsub.f32 %v1160_v57, %v458_v32 }
 0x204   :  { %882 = vpow2.f32 %v537_v48 }
 0x205   :  { %v539_v51 = vmul.f32 1.442695, %v501_v33  ;;  %v541_v34 = vmul.f32 1.442695, %v502_v50 }
 0x206   :  { %v461_v35 = vpop.xlane.xlu0 %460 }
 0x207   :  { %884 = vpow2.f32 %v539_v51  ;;  %v503_v37 = vsub.f32 %v1164_v0, %v461_v35  ;;  %v504_v53 = vsub.f32 %v1166_v1, %v461_v35 }
 0x208   :  { %v873_v39 = vpop.eup %872  ;;  %886 = vpow2.f32 %v541_v34 }
 0x209   :  { %v875_v54 = vpop.eup %874  ;;  %v543_v40 = vmul.f32 1.442695, %v503_v37  ;;  %v545_v41 = vmul.f32 1.442695, %v504_v53 }
 0x20a   :  { %v464_v42 = vpop.xlane.xlu1 %463  ;;  %v591_v43 = vadd.f32 %v875_v54, %v873_v39 }
 0x20b   :  { %888 = vpow2.f32 %v543_v40  ;;  %v505_v56 = vsub.f32 %v1170_v8, %v464_v42  ;;  %v506_v57 = vsub.f32 %v1172_v10, %v464_v42 }
 0x20c   :  { %v877_v44 = vpop.eup %876  ;;  %890 = vpow2.f32 %v545_v41  ;;  %592 = vadd.xlane.f32.xlu0 %v591_v43 }
 0x20d   :  { %v879_v46 = vpop.eup %878  ;;  %v547_v52 = vmul.f32 1.442695, %v505_v56  ;;  %v549_v0 = vmul.f32 1.442695, %v506_v57  ;;  %v639_v59 = vpack.c.bf16 %v877_v44, %v873_v39 }
 0x20e   :  { %v467_v1 = vpop.xlane.xlu0 %466  ;;  %v640_v62 = vpack.c.bf16 %v879_v46, %v875_v54  ;;  %v594_v2 = vadd.f32 %v879_v46, %v877_v44 }
 0x20f   :  { %892 = vpow2.f32 %v547_v52  ;;  %v507_v5 = vsub.f32 %v1176_v17, %v467_v1  ;;  %v508_v9 = vsub.f32 %v1178_v19, %v467_v1 }
 0x210   :  { %v881_v13 = vpop.eup %880  ;;  %894 = vpow2.f32 %v549_v0  ;;  %687 = vmatprep.mubr.bf16.mxu1 %v640_v62  ;;  %595 = vadd.xlane.f32.xlu1 %v594_v2 }
 0x211   :  { %v883_v8 = vpop.eup %882  ;;  %v551_v10 = vmul.f32 1.442695, %v507_v5  ;;  %v553_v14 = vmul.f32 1.442695, %v508_v9  ;;  %688 = vmatmul.mubr.bf16.vlgmr.msra.gmra.mxu1 %v639_v59 }
 0x212   :  { %v470_v15 = vpop.xlane.xlu1 %469  ;;  %v597_v16 = vadd.f32 %v883_v8, %v881_v13 }
 0x213   :  { %896 = vpow2.f32 %v551_v10  ;;  %v509_v18 = vsub.f32 %v1182_v27, %v470_v15  ;;  %v510_v20 = vsub.f32 %v1184_v29, %v470_v15 }
 0x214   :  { %v885_v22 = vpop.eup %884  ;;  %898 = vpow2.f32 %v553_v14  ;;  %598 = vadd.xlane.f32.xlu0 %v597_v16 }
 0x215   :  { %v887_v17 = vpop.eup %886  ;;  %v555_v19 = vmul.f32 1.442695, %v509_v18  ;;  %v557_v23 = vmul.f32 1.442695, %v510_v20  ;;  %v641_v24 = vpack.c.bf16 %v885_v22, %v881_v13 }
 0x216   :  { %v473_v25 = vpop.xlane.xlu0 %472  ;;  %v642_v26 = vpack.c.bf16 %v887_v17, %v883_v8  ;;  %v600_v28 = vadd.f32 %v887_v17, %v885_v22 }
 0x217   :  { %900 = vpow2.f32 %v555_v19  ;;  %v511_v30 = vsub.f32 %v1188_v36, %v473_v25  ;;  %v512_v31 = vsub.f32 %v1190_v38, %v473_v25 }
 0x218   :  { %v889_v47 = vpop.eup %888  ;;  %902 = vpow2.f32 %v557_v23  ;;  %697 = vmatprep.mubr.bf16.mxu1 %v642_v26  ;;  %601 = vadd.xlane.f32.xlu1 %v600_v28 }
 0x219   :  { %v891_v27 = vpop.eup %890  ;;  %v559_v29 = vmul.f32 1.442695, %v511_v30  ;;  %v561_v48 = vmul.f32 1.442695, %v512_v31  ;;  %698 = vmatmul.mubr.bf16.gmra.mxu1 %v641_v24 }
 0x21a   :  { %v476_v32 = vpop.xlane.xlu1 %475  ;;  %v603_v33 = vadd.f32 %v891_v27, %v889_v47 }
 0x21b   :  { %904 = vpow2.f32 %v559_v29  ;;  %v513_v50 = vsub.f32 %v1194_v45, %v476_v32  ;;  %v514_v51 = vsub.f32 %v1196_v49, %v476_v32 }
 0x21c   :  { %v893_v34 = vpop.eup %892  ;;  %906 = vpow2.f32 %v561_v48  ;;  %604 = vadd.xlane.f32.xlu0 %v603_v33 }
 0x21d   :  { %v895_v36 = vpop.eup %894  ;;  %v563_v38 = vmul.f32 1.442695, %v513_v50  ;;  %v565_v35 = vmul.f32 1.442695, %v514_v51  ;;  %v643_v37 = vpack.c.bf16 %v893_v34, %v889_v47 }
 0x21e   :  { %v479_v53 = vpop.xlane.xlu0 %478  ;;  %v644_v39 = vpack.c.bf16 %v895_v36, %v891_v27  ;;  %v606_v54 = vadd.f32 %v895_v36, %v893_v34 }
 0x21f   :  { %908 = vpow2.f32 %v563_v38  ;;  %v515_v40 = vsub.f32 %v1200_v55, %v479_v53  ;;  %v516_v41 = vsub.f32 %v1202_v58, %v479_v53 }
 0x220   :  { %v897_v42 = vpop.eup %896  ;;  %910 = vpow2.f32 %v565_v35  ;;  %707 = vmatprep.mubr.bf16.mxu1 %v644_v39  ;;  %607 = vadd.xlane.f32.xlu1 %v606_v54 }
 0x221   :  { %v899_v45 = vpop.eup %898  ;;  %v567_v49 = vmul.f32 1.442695, %v515_v40  ;;  %v569_v43 = vmul.f32 1.442695, %v516_v41  ;;  %708 = vmatmul.mubr.bf16.gmra.mxu1 %v643_v37 }
 0x222   :  { %v482_v56 = vpop.xlane.xlu1 %481  ;;  %v609_v57 = vadd.f32 %v899_v45, %v897_v42 }
 0x223   :  { %912 = vpow2.f32 %v567_v49  ;;  %v517_v44 = vsub.f32 %v1206_v60, %v482_v56  ;;  %v518_v46 = vsub.f32 %v1208_v61, %v482_v56 }
 0x224   :  { %v901_v52 = vpop.eup %900  ;;  %914 = vpow2.f32 %v569_v43  ;;  %610 = vadd.xlane.f32.xlu0 %v609_v57 }
 0x225   :  { %v903_v55 = vpop.eup %902  ;;  %v571_v58 = vmul.f32 1.442695, %v517_v44  ;;  %v573_v0 = vmul.f32 1.442695, %v518_v46  ;;  %v645_v59 = vpack.c.bf16 %v901_v52, %v897_v42 }
 0x226   :  { %v485_v1 = vpop.xlane.xlu0 %484  ;;  %v646_v62 = vpack.c.bf16 %v903_v55, %v899_v45  ;;  %v612_v2 = vadd.f32 %v903_v55, %v901_v52 }
 0x227   :  { %916 = vpow2.f32 %v571_v58  ;;  %v519_v5 = vsub.f32 %v1212_v63, %v485_v1  ;;  %v520_v9 = vsub.f32 %v1214_v21, %v485_v1 }
 0x228   :  { %v905_v13 = vpop.eup %904  ;;  %918 = vpow2.f32 %v573_v0  ;;  %717 = vmatprep.mubr.bf16.mxu1 %v646_v62  ;;  %613 = vadd.xlane.f32.xlu1 %v612_v2 }
 0x229   :  { %v907_v60 = vpop.eup %906  ;;  %v575_v61 = vmul.f32 1.442695, %v519_v5  ;;  %v577_v8 = vmul.f32 1.442695, %v520_v9  ;;  %718 = vmatmul.mubr.bf16.gmra.mxu1 %v645_v59 }
 0x22a   :  { %v488_v10 = vpop.xlane.xlu1 %487  ;;  %v615_v14 = vadd.f32 %v907_v60, %v905_v13 }
 0x22b   :  { %920 = vpow2.f32 %v575_v61  ;;  %v521_v15 = vsub.f32 %v1218_v3, %v488_v10  ;;  %v522_v16 = vsub.f32 %v1220_v4, %v488_v10 }
 0x22c   :  { %v909_v18 = vpop.eup %908  ;;  %922 = vpow2.f32 %v577_v8  ;;  %616 = vadd.xlane.f32.xlu0 %v615_v14 }
 0x22d   :  { %v911_v63 = vpop.eup %910  ;;  %v579_v21 = vmul.f32 1.442695, %v521_v15  ;;  %v581_v20 = vmul.f32 1.442695, %v522_v16  ;;  %v647_v22 = vpack.c.bf16 %v909_v18, %v905_v13 }
 0x22e   :  { %v491_v17 = vpop.xlane.xlu0 %490  ;;  %v648_v19 = vpack.c.bf16 %v911_v63, %v907_v60  ;;  %v618_v23 = vadd.f32 %v911_v63, %v909_v18 }
 0x22f   :  { %924 = vpow2.f32 %v579_v21  ;;  %v523_v24 = vsub.f32 %v1224_v6, %v491_v17  ;;  %v524_v25 = vsub.f32 %v1226_v7, %v491_v17 }
 0x230   :  { %v913_v26 = vpop.eup %912  ;;  %926 = vpow2.f32 %v581_v20  ;;  %727 = vmatprep.mubr.bf16.mxu1 %v648_v19  ;;  %619 = vadd.xlane.f32.xlu1 %v618_v23 }
 0x231   :  { %v915_v3 = vpop.eup %914  ;;  %v583_v4 = vmul.f32 1.442695, %v523_v24  ;;  %v585_v28 = vmul.f32 1.442695, %v524_v25  ;;  %728 = vmatmul.mubr.bf16.gmra.mxu1 %v647_v22 }
 0x232   :  { %v494_v30 = vpop.xlane.xlu1 %493  ;;  %v621_v31 = vadd.f32 %v915_v3, %v913_v26 }
 0x233   :  { %928 = vpow2.f32 %v583_v4  ;;  %v525_v47 = vsub.f32 %v1230_v11, %v494_v30  ;;  %v526_v27 = vsub.f32 %v1232_v12, %v494_v30 }
 0x234   :  { %v917_v29 = vpop.eup %916  ;;  %930 = vpow2.f32 %v585_v28  ;;  %622 = vadd.xlane.f32.xlu0 %v621_v31 }
 0x235   :  { %v919_v6 = vpop.eup %918  ;;  %v587_v7 = vmul.f32 1.442695, %v525_v47  ;;  %v589_v48 = vmul.f32 1.442695, %v526_v27  ;;  %v649_v32 = vpack.c.bf16 %v917_v29, %v913_v26 }
 0x236   :  { %v650_v33 = vpack.c.bf16 %v919_v6, %v915_v3  ;;  %v624_v50 = vadd.f32 %v919_v6, %v917_v29 }
 0x237   :  { %932 = vpow2.f32 %v587_v7 }
 0x238   :  { %v921_v51 = vpop.eup %920  ;;  %934 = vpow2.f32 %v589_v48  ;;  %737 = vmatprep.mubr.bf16.mxu1 %v650_v33  ;;  %625 = vadd.xlane.f32.xlu1 %v624_v50 }
 0x239   :  { %v923_v34 = vpop.eup %922  ;;  %738 = vmatmul.mubr.bf16.gmra.mxu1 %v649_v32 }
 0x23a   :  { %v627_v36 = vadd.f32 %v923_v34, %v921_v51 }
 0x23c   :  { %v925_v11 = vpop.eup %924  ;;  %628 = vadd.xlane.f32.xlu0 %v627_v36 }
 0x23d   :  { %v927_v12 = vpop.eup %926  ;;  %v651_v38 = vpack.c.bf16 %v925_v11, %v921_v51 }
 0x23e   :  { %v652_v35 = vpack.c.bf16 %v927_v12, %v923_v34  ;;  %v630_v37 = vadd.f32 %v927_v12, %v925_v11 }
 0x240   :  { %v929_v53 = vpop.eup %928  ;;  %747 = vmatprep.mubr.bf16.mxu1 %v652_v35  ;;  %631 = vadd.xlane.f32.xlu1 %v630_v37 }
 0x241   :  { %v931_v39 = vpop.eup %930  ;;  %748 = vmatmul.mubr.bf16.gmra.mxu1 %v651_v38 }
 0x242   :  { %v633_v54 = vadd.f32 %v931_v39, %v929_v53 }
 0x244   :  { %v933_v40 = vpop.eup %932  ;;  %634 = vadd.xlane.f32.xlu0 %v633_v54 }
 0x245   :  { %v935_v41 = vpop.eup %934  ;;  %v653_v42 = vpack.c.bf16 %v933_v40, %v929_v53 }
 0x246   :  { %v654_v45 = vpack.c.bf16 %v935_v41, %v931_v39  ;;  %v636_v49 = vadd.f32 %v935_v41, %v933_v40 }
 0x248   :  { %757 = vmatprep.mubr.bf16.mxu1 %v654_v45  ;;  %637 = vadd.xlane.f32.xlu1 %v636_v49 }
 0x249   :  { %758 = vmatmul.mubr.bf16.gmra.mxu1 %v653_v42 }
 0x295   :  { %v593_v43 = vpop.xlane.xlu0 %592 }
 0x296   :  { %936 = vrcp.f32 %v593_v43 }
 0x299   :  { %v596_v56 = vpop.xlane.xlu1 %595 }
 0x29a   :  { %938 = vrcp.f32 %v596_v56 }
 0x29d   :  { %v599_v57 = vpop.xlane.xlu0 %598 }
 0x29e   :  { %940 = vrcp.f32 %v599_v57 }
 0x2a1   :  { %v602_v44 = vpop.xlane.xlu1 %601 }
 0x2a2   :  { %942 = vrcp.f32 %v602_v44 }
 0x2a3   :  { %v937_v46 = vpop.eup %936 }
 0x2a5   :  { %v605_v52 = vpop.xlane.xlu0 %604 }
 0x2a6   :  { %944 = vrcp.f32 %v605_v52 }
 0x2a7   :  { %v939_v1 = vpop.eup %938 }
 0x2a9   :  { %v608_v62 = vpop.xlane.xlu1 %607 }
 0x2aa   :  { %946 = vrcp.f32 %v608_v62 }
 0x2ab   :  { %v941_v60 = vpop.eup %940 }
 0x2ad   :  { %v611_v61 = vpop.xlane.xlu0 %610 }
 0x2ae   :  { %948 = vrcp.f32 %v611_v61 }
 0x2af   :  { %v943_v16 = vpop.eup %942 }
 0x2b1   :  { %v614_v18 = vpop.xlane.xlu1 %613 }
 0x2b2   :  { %950 = vrcp.f32 %v614_v18 }
 0x2b3   :  { %v945_v17 = vpop.eup %944 }
 0x2b5   :  { %v617_v19 = vpop.xlane.xlu0 %616 }
 0x2b6   :  { %952 = vrcp.f32 %v617_v19 }
 0x2b7   :  { %v947_v3 = vpop.eup %946 }
 0x2b9   :  { %v620_v4 = vpop.xlane.xlu1 %619 }
 0x2ba   :  { %954 = vrcp.f32 %v620_v4 }
 0x2bb   :  { %v949_v27 = vpop.eup %948 }
 0x2bd   :  { %v623_v29 = vpop.xlane.xlu0 %622 }
 0x2be   :  { %956 = vrcp.f32 %v623_v29 }
 0x2bf   :  { %v951_v33 = vpop.eup %950 }
 0x2c1   :  { %v626_v50 = vpop.xlane.xlu1 %625 }
 0x2c2   :  { %958 = vrcp.f32 %v626_v50 }
 0x2c3   :  { %v953_v12 = vpop.eup %952 }
 0x2c5   :  { %v629_v38 = vpop.xlane.xlu0 %628 }
 0x2c6   :  { %960 = vrcp.f32 %v629_v38 }
 0x2c7   :  { %v955_v54 = vpop.eup %954 }
 0x2c9   :  { %v632_v40 = vpop.xlane.xlu1 %631 }
 0x2ca   :  { %962 = vrcp.f32 %v632_v40 }
 0x2cb   :  { %v957_v43 = vpop.eup %956 }
 0x2cd   :  { %v635_v56 = vpop.xlane.xlu0 %634 }
 0x2ce   :  { %964 = vrcp.f32 %v635_v56 }
 0x2d1   :  { %v689_v55 = vpop.f32.mrf.mxu1 }
 0x2d2   :  { %v784_v58 = vmul.f32 %v937_v46, %v689_v55  ;;  %v959_v55 = vpop.eup %958 }
 0x2d3   :  { %v691_v0 = vpop.f32.mrf.mxu1 }
 0x2d4   :  { %816 = vst [vmem:[#allocation13] sm:$0xff] %v784_v58  ;;  %v785_v59 = vmul.f32 %v937_v46, %v691_v0  ;;  %v638_v58 = vpop.xlane.xlu1 %637 }
 0x2d5   :  { %v693_v2 = vpop.f32.mrf.mxu1  ;;  %966 = vrcp.f32 %v638_v58 }
 0x2d6   :  { %817 = vst [vmem:[#allocation13 + $0x8] sm:$0xff] %v785_v59  ;;  %v786_v5 = vmul.f32 %v939_v1, %v693_v2  ;;  %v961_v2 = vpop.eup %960 }
 0x2d7   :  { %v695_v9 = vpop.f32.mrf.mxu1  ;;  %v963_v61 = vpop.eup %962 }
 0x2d8   :  { %818 = vst [vmem:[#allocation13 + $0x10] sm:$0xff] %v786_v5  ;;  %v787_v13 = vmul.f32 %v939_v1, %v695_v9 }
 0x2d9   :  { %v699_v8 = vpop.f32.mrf.mxu1 }
 0x2da   :  { %819 = vst [vmem:[#allocation13 + $0x18] sm:$0xff] %v787_v13  ;;  %v788_v10 = vmul.f32 %v941_v60, %v699_v8 }
 0x2db   :  { %v701_v14 = vpop.f32.mrf.mxu1 }
 0x2dc   :  { %820 = vst [vmem:[#allocation13 + $0x20] sm:$0xff] %v788_v10  ;;  %v789_v15 = vmul.f32 %v941_v60, %v701_v14 }
 0x2dd   :  { %v703_v63 = vpop.f32.mrf.mxu1 }
 0x2de   :  { %821 = vst [vmem:[#allocation13 + $0x28] sm:$0xff] %v789_v15  ;;  %v790_v21 = vmul.f32 %v943_v16, %v703_v63 }
 0x2df   :  { %v705_v20 = vpop.f32.mrf.mxu1 }
 0x2e0   :  { %822 = vst [vmem:[#allocation13 + $0x30] sm:$0xff] %v790_v21  ;;  %v791_v22 = vmul.f32 %v943_v16, %v705_v20  ;;  %v965_v16 = vpop.eup %964 }
 0x2e1   :  { %v709_v23 = vpop.f32.mrf.mxu1 }
 0x2e2   :  { %823 = vst [vmem:[#allocation13 + $0x38] sm:$0xff] %v791_v22  ;;  %v792_v24 = vmul.f32 %v945_v17, %v709_v23  ;;  %v967_v22 = vpop.eup %966 }
 0x2e3   :  { %v711_v25 = vpop.f32.mrf.mxu1 }
 0x2e4   :  { %824 = vst [vmem:[#allocation13 + $0x40] sm:$0xff] %v792_v24  ;;  %v793_v26 = vmul.f32 %v945_v17, %v711_v25 }
 0x2e5   :  { %v713_v28 = vpop.f32.mrf.mxu1 }
 0x2e6   :  { %825 = vst [vmem:[#allocation13 + $0x48] sm:$0xff] %v793_v26  ;;  %v794_v30 = vmul.f32 %v947_v3, %v713_v28 }
 0x2e7   :  { %v715_v31 = vpop.f32.mrf.mxu1 }
 0x2e8   :  { %826 = vst [vmem:[#allocation13 + $0x50] sm:$0xff] %v794_v30  ;;  %v795_v47 = vmul.f32 %v947_v3, %v715_v31 }
 0x2e9   :  { %v719_v6 = vpop.f32.mrf.mxu1 }
 0x2ea   :  { %827 = vst [vmem:[#allocation13 + $0x58] sm:$0xff] %v795_v47  ;;  %v796_v7 = vmul.f32 %v949_v27, %v719_v6 }
 0x2eb   :  { %v721_v48 = vpop.f32.mrf.mxu1 }
 0x2ec   :  { %828 = vst [vmem:[#allocation13 + $0x60] sm:$0xff] %v796_v7  ;;  %v797_v32 = vmul.f32 %v949_v27, %v721_v48 }
 0x2ed   :  { %v723_v51 = vpop.f32.mrf.mxu1 }
 0x2ee   :  { %829 = vst [vmem:[#allocation13 + $0x68] sm:$0xff] %v797_v32  ;;  %v798_v34 = vmul.f32 %v951_v33, %v723_v51 }
 0x2ef   :  { %v725_v36 = vpop.f32.mrf.mxu1 }
 0x2f0   :  { %830 = vst [vmem:[#allocation13 + $0x70] sm:$0xff] %v798_v34  ;;  %v799_v11 = vmul.f32 %v951_v33, %v725_v36 }
 0x2f1   :  { %v729_v35 = vpop.f32.mrf.mxu1 }
 0x2f2   :  { %831 = vst [vmem:[#allocation13 + $0x78] sm:$0xff] %v799_v11  ;;  %v800_v37 = vmul.f32 %v953_v12, %v729_v35 }
 0x2f3   :  { %v731_v53 = vpop.f32.mrf.mxu1 }
 0x2f4   :  { %832 = vst [vmem:[#allocation13 + $0x80] sm:$0xff] %v800_v37  ;;  %v801_v39 = vmul.f32 %v953_v12, %v731_v53 }
 0x2f5   :  { %v733_v41 = vpop.f32.mrf.mxu1 }
 0x2f6   :  { %833 = vst [vmem:[#allocation13 + $0x88] sm:$0xff] %v801_v39  ;;  %v802_v42 = vmul.f32 %v955_v54, %v733_v41 }
 0x2f7   :  { %v735_v45 = vpop.f32.mrf.mxu1 }
 0x2f8   :  { %834 = vst [vmem:[#allocation13 + $0x90] sm:$0xff] %v802_v42  ;;  %v803_v49 = vmul.f32 %v955_v54, %v735_v45 }
 0x2f9   :  { %v739_v57 = vpop.f32.mrf.mxu1 }
 0x2fa   :  { %835 = vst [vmem:[#allocation13 + $0x98] sm:$0xff] %v803_v49  ;;  %v804_v44 = vmul.f32 %v957_v43, %v739_v57 }
 0x2fb   :  { %v741_v46 = vpop.f32.mrf.mxu1 }
 0x2fc   :  { %836 = vst [vmem:[#allocation13 + $0xa0] sm:$0xff] %v804_v44  ;;  %v805_v52 = vmul.f32 %v957_v43, %v741_v46 }
 0x2fd   :  { %v743_v0 = vpop.f32.mrf.mxu1 }
 0x2fe   :  { %837 = vst [vmem:[#allocation13 + $0xa8] sm:$0xff] %v805_v52  ;;  %v806_v59 = vmul.f32 %v959_v55, %v743_v0 }
 0x2ff   :  { %v745_v1 = vpop.f32.mrf.mxu1 }
 0x300   :  { %838 = vst [vmem:[#allocation13 + $0xb0] sm:$0xff] %v806_v59  ;;  %v807_v62 = vmul.f32 %v959_v55, %v745_v1 }
 0x301   :  { %v749_v5 = vpop.f32.mrf.mxu1 }
 0x302   :  { %839 = vst [vmem:[#allocation13 + $0xb8] sm:$0xff] %v807_v62  ;;  %v808_v9 = vmul.f32 %v961_v2, %v749_v5 }
 0x303   :  { %v751_v13 = vpop.f32.mrf.mxu1 }
 0x304   :  { %840 = vst [vmem:[#allocation13 + $0xc0] sm:$0xff] %v808_v9  ;;  %v809_v60 = vmul.f32 %v961_v2, %v751_v13 }
 0x305   :  { %v753_v8 = vpop.f32.mrf.mxu1 }
 0x306   :  { %841 = vst [vmem:[#allocation13 + $0xc8] sm:$0xff] %v809_v60  ;;  %v810_v10 = vmul.f32 %v963_v61, %v753_v8 }
 0x307   :  { %v755_v14 = vpop.f32.mrf.mxu1 }
 0x308   :  { %842 = vst [vmem:[#allocation13 + $0xd0] sm:$0xff] %v810_v10  ;;  %v811_v15 = vmul.f32 %v963_v61, %v755_v14 }
 0x309   :  { %v759_v18 = vpop.f32.mrf.mxu1 }
 0x30a   :  { %843 = vst [vmem:[#allocation13 + $0xd8] sm:$0xff] %v811_v15  ;;  %v812_v63 = vmul.f32 %v965_v16, %v759_v18 }
 0x30b   :  { %v761_v21 = vpop.f32.mrf.mxu1 }
 0x30c   :  { %844 = vst [vmem:[#allocation13 + $0xe0] sm:$0xff] %v812_v63  ;;  %v813_v20 = vmul.f32 %v965_v16, %v761_v21 }
 0x30d   :  { %v763_v17 = vpop.f32.mrf.mxu1 }
 0x30e   :  { %845 = vst [vmem:[#allocation13 + $0xe8] sm:$0xff] %v813_v20  ;;  %v814_v19 = vmul.f32 %v967_v22, %v763_v17 }
 0x30f   :  { %v765_v23 = vpop.f32.mrf.mxu1 }
 0x310   :  { %846 = vst [vmem:[#allocation13 + $0xf0] sm:$0xff] %v814_v19  ;;  %v815_v24 = vmul.f32 %v967_v22, %v765_v23 }
 0x312   :  { %847 = vst [vmem:[#allocation13 + $0xf8] sm:$0xff] %v815_v24 }
 0x313   :  { %1039 = shalt.err (!%p1036_p5)
}
 0x314   :  { %859 = dma.vmem_to_hbm [thread:$0]  %s854_s5, 4096, %s1278_s4, [#allocation9], %s1056_s20, %s1056_s20, %s1057_s21  }
 0x315   :  { %1052 = dma.done.wait [#allocation9], 4096  }
 0x316   :  { %1053 = vsyncadd [#allocation9], 4294963200 }
 0x317   :  { %863 = vsyncpa [#allocation8], 1 }
 0x318   :  { %864 = vsyncpa [#allocation11], 1 }
 0x319   :  { %865 = vsyncpa [#allocation9], 1 }

</bundles_post_ra>
